<compile_context>
chip_gen: v5e
topology: v5e:2x2
jax: 0.10.0
libtpu: 0.0.40
codegen_flags: <defaults>
</compile_context>

<pallas_src>
import functools

import jax
import jax.numpy as jnp
from jax.experimental import pallas as pl
from jax.experimental.pallas import tpu as pltpu


def _round_up(n, m):
    return (n + m - 1) // m * m


def _mlp_kernel(x_ref, w1_ref, w2_ref, w3_ref, w4_ref,
                b1_ref, b2_ref, b3_ref, b4_ref, o_ref):
    # x: (TB, F_pad) bf16 | w_l: (in_pad, out_pad) bf16 | b_l: (1, out_pad) f32
    # o: (TB, 128) f32
    h = x_ref[...]
    # Layer 1: Linear + ReLU
    h = jnp.dot(h, w1_ref[...], preferred_element_type=jnp.float32)
    h = jnp.maximum(h + b1_ref[...], 0.0).astype(jnp.bfloat16)
    # Layer 2: Linear + ReLU
    h = jnp.dot(h, w2_ref[...], preferred_element_type=jnp.float32)
    h = jnp.maximum(h + b2_ref[...], 0.0).astype(jnp.bfloat16)
    # Layer 3: Linear + ReLU
    h = jnp.dot(h, w3_ref[...], preferred_element_type=jnp.float32)
    h = jnp.maximum(h + b3_ref[...], 0.0).astype(jnp.bfloat16)
    # Layer 4: Linear (no activation)
    h = jnp.dot(h, w4_ref[...], preferred_element_type=jnp.float32)
    o_ref[...] = (h + b4_ref[...]).astype(o_ref.dtype)


def prepare_params(params):
    """One-time padding of weights/biases (hoisted out of the per-call path).

    Weights [in,out] -> bf16 zero-padded to (round_up(in,128), round_up(out,128)).
    Biases  [1,out]  -> f32  zero-padded to (1, round_up(out,128)).
    Zero padding is exact: padded weight rows/cols and bias lanes contribute 0
    and ReLU(0) == 0, so padded activation lanes stay 0 through the network.
    """
    padded = {}
    for i in range(1, 5):
        w = params[f"w{i}"]
        b = params[f"b{i}"].reshape(-1)
        d_in, d_out = w.shape
        p_in, p_out = _round_up(d_in, 128), _round_up(d_out, 128)
        padded[f"w{i}"] = (jnp.zeros((p_in, p_out), jnp.bfloat16)
                           .at[:d_in, :d_out].set(w.astype(jnp.bfloat16)))
        padded[f"b{i}"] = (jnp.zeros((1, p_out), jnp.float32)
                           .at[0, :d_out].set(b.astype(jnp.float32)))
    return padded


def _resident(shape):
    # Constant index_map => fetched exactly once, kept VMEM-resident across all
    # batch tiles; Buffered(1) drops the pointless second pipeline buffer.
    return pl.BlockSpec(shape, lambda i: (0, 0), pipeline_mode=pl.Buffered(1))


@functools.partial(jax.jit, static_argnames=("block_b", "out_features"))
def scalar_reward_estimator(x, padded_params, *, block_b=512, out_features=4):
    """x: [B, F] float32. padded_params: output of prepare_params()."""
    B, F = x.shape
    F_pad, H_pad = padded_params["w1"].shape
    M_pad = padded_params["w2"].shape[1]
    R_pad = padded_params["w3"].shape[1]
    O_pad = padded_params["w4"].shape[1]
    assert F <= F_pad

    # Batch tile: multiple of 16 (bf16 sublane packing); capped so the batch
    # grid has >= 2 steps whenever B allows it (keeps both v7x TCs busy).
    b16 = _round_up(B, 16)
    tb_cap = max(16, _round_up(b16 // 2, 16))
    TB = min(_round_up(block_b, 16), tb_cap)
    B_pad = _round_up(B, TB)
    grid = (B_pad // TB,)

    x_p = (jnp.zeros((B_pad, F_pad), jnp.bfloat16)
           .at[:B, :F].set(x.astype(jnp.bfloat16)))

    # Explicit scoped-VMEM budget: single-buffered weights/biases + double-
    # buffered x/out blocks + in-kernel activations, with 2x headroom.
    w_bytes = sum(padded_params[f"w{i}"].size * 2 for i in range(1, 5))   # bf16
    b_bytes = sum(padded_params[f"b{i}"].size * 4 for i in range(1, 5))   # f32
    io_bytes = 2 * TB * (F_pad * 2 + O_pad * 4)                           # x + out, 2-deep
    act_bytes = 4 * TB * max(H_pad, M_pad, R_pad, O_pad) * 4              # temporaries (rough)
    vmem_limit = int(max(32 << 20,
                         min(64 << 20,
                             2 * (w_bytes + b_bytes + io_bytes + act_bytes))))

    out_padded = pl.pallas_call(
        _mlp_kernel,
        out_shape=jax.ShapeDtypeStruct((B_pad, O_pad), jnp.float32),
        grid=grid,
        in_specs=[
            # x: streamed per batch tile (default double buffering; Buffered(3)
            # is a cheap sweep candidate once weights are resident).
            pl.BlockSpec((TB, F_pad), lambda i: (i, 0)),
            _resident((F_pad, H_pad)),   # w1
            _resident((H_pad, M_pad)),   # w2
            _resident((M_pad, R_pad)),   # w3
            _resident((R_pad, O_pad)),   # w4
            _resident((1, H_pad)),       # b1
            _resident((1, M_pad)),       # b2
            _resident((1, R_pad)),       # b3
            _resident((1, O_pad)),       # b4
        ],
        out_specs=pl.BlockSpec((TB, O_pad), lambda i: (i, 0)),  # lane-dense (TB,128)
        compiler_params=pltpu.CompilerParams(
            dimension_semantics=("parallel",),   # split batch across TCs (v7x)
            vmem_limit_bytes=vmem_limit,
        ),
    )(x_p,
      padded_params["w1"], padded_params["w2"],
      padded_params["w3"], padded_params["w4"],
      padded_params["b1"], padded_params["b2"],
      padded_params["b3"], padded_params["b4"])

    return out_padded[:B, :out_features]


def init_params(key, num_dim_features, num_dim_rewards, hidden_size):
    """Deterministic init matching nn.Linear default; weights stored as [in, out]."""
    dims = [(num_dim_features, hidden_size),
            (hidden_size, 50),
            (50, num_dim_rewards),
            (num_dim_rewards, 4)]
    params = {}
    for i, (fan_in, fan_out) in enumerate(dims, start=1):
        key, kw, kb = jax.random.split(key, 3)
        bound = 1.0 / (fan_in ** 0.5)
        params[f"w{i}"] = jax.random.uniform(
            kw, (fan_in, fan_out), jnp.float32, minval=-bound, maxval=bound)
        params[f"b{i}"] = jax.random.uniform(
            kb, (1, fan_out), jnp.float32, minval=-bound, maxval=bound)
    return params


def _reference(x, params):
    """Same math as the kernel (bf16 operands, f32 accumulation, f32 bias add)."""
    def lin(h, w, b, relu):
        y = jnp.dot(h.astype(jnp.bfloat16), w.astype(jnp.bfloat16),
                    preferred_element_type=jnp.float32) + b.reshape(1, -1)
        return jnp.maximum(y, 0.0) if relu else y
    h = lin(x, params["w1"], params["b1"], True)
    h = lin(h, params["w2"], params["b2"], True)
    h = lin(h, params["w3"], params["b3"], True)
    return lin(h, params["w4"], params["b4"], False)


if __name__ == "__main__":
    num_dim_features = 32
    num_dim_rewards = 16
    hidden_size = 32
    batch = 8

    key = jax.random.PRNGKey(0)
    key, kx = jax.random.split(key)
    x = jax.random.normal(kx, (batch, num_dim_features), jnp.float32)
    params = init_params(key, num_dim_features, num_dim_rewards, hidden_size)

    # One-time parameter preparation (padding / dtype cast hoisted out of the
    # per-call path).
    padded_params = prepare_params(params)

    out = scalar_reward_estimator(x, padded_params)
    out = jax.block_until_ready(out)

    ref = _reference(x, params)
    assert out.shape == (batch, 4), out.shape
    assert jnp.allclose(out, ref, atol=3e-2, rtol=3e-2), float(jnp.max(jnp.abs(out - ref)))

    print("KERNEL_OK")
</pallas_src>

<mosaic_0001>
module attributes {stable_mosaic.version = 11 : i64} {
  func.func @_mlp_kernel(%arg0: i32, %arg1: memref<16x128xbf16, #tpu.memory_space<vmem>>, %arg2: memref<128x128xbf16, #tpu.memory_space<vmem>>, %arg3: memref<128x128xbf16, #tpu.memory_space<vmem>>, %arg4: memref<128x128xbf16, #tpu.memory_space<vmem>>, %arg5: memref<128x128xbf16, #tpu.memory_space<vmem>>, %arg6: memref<1x128xf32, #tpu.memory_space<vmem>>, %arg7: memref<1x128xf32, #tpu.memory_space<vmem>>, %arg8: memref<1x128xf32, #tpu.memory_space<vmem>>, %arg9: memref<1x128xf32, #tpu.memory_space<vmem>>, %arg10: memref<16x128xf32, #tpu.memory_space<vmem>>) attributes {dimension_semantics = [#tpu.dimension_semantics<parallel>], iteration_bounds = array<i64: 1>, scalar_prefetch = 0 : i64, scratch_operands = 0 : i64, tpu.core_type = #tpu.core_type<tc>, window_params = [{transform_indices = @transform_0, window_bounds = array<i64: 16, 128>}, {pipeline_mode = #tpu.pipeline_mode<synchronous>, transform_indices = @transform_1, window_bounds = array<i64: 128, 128>}, {pipeline_mode = #tpu.pipeline_mode<synchronous>, transform_indices = @transform_2, window_bounds = array<i64: 128, 128>}, {pipeline_mode = #tpu.pipeline_mode<synchronous>, transform_indices = @transform_3, window_bounds = array<i64: 128, 128>}, {pipeline_mode = #tpu.pipeline_mode<synchronous>, transform_indices = @transform_4, window_bounds = array<i64: 128, 128>}, {pipeline_mode = #tpu.pipeline_mode<synchronous>, transform_indices = @transform_5, window_bounds = array<i64: 1, 128>}, {pipeline_mode = #tpu.pipeline_mode<synchronous>, transform_indices = @transform_6, window_bounds = array<i64: 1, 128>}, {pipeline_mode = #tpu.pipeline_mode<synchronous>, transform_indices = @transform_7, window_bounds = array<i64: 1, 128>}, {pipeline_mode = #tpu.pipeline_mode<synchronous>, transform_indices = @transform_8, window_bounds = array<i64: 1, 128>}, {transform_indices = @transform_9, window_bounds = array<i64: 16, 128>}]} {
    %c0 = arith.constant 0 : index
    %c0_0 = arith.constant 0 : index
    %0 = vector.load %arg1[%c0, %c0_0] : memref<16x128xbf16, #tpu.memory_space<vmem>>, vector<16x128xbf16>
    %c0_1 = arith.constant 0 : index
    %c0_2 = arith.constant 0 : index
    %1 = vector.load %arg2[%c0_1, %c0_2] : memref<128x128xbf16, #tpu.memory_space<vmem>>, vector<128x128xbf16>
    %cst = arith.constant dense<0.000000e+00> : vector<16x128xf32>
    %2 = tpu.matmul %0, %1, %cst {dimension_numbers = #tpu.dot_dimension_numbers<[1], [0], [0], [1], [0, 0, 1, 1], [], []>} : vector<16x128xbf16>, vector<128x128xbf16>, vector<16x128xf32> -> vector<16x128xf32>
    %c0_3 = arith.constant 0 : index
    %c0_4 = arith.constant 0 : index
    %3 = vector.load %arg6[%c0_3, %c0_4] : memref<1x128xf32, #tpu.memory_space<vmem>>, vector<1x128xf32>
    %4 = vector.broadcast %3 : vector<1x128xf32> to vector<16x128xf32>
    %5 = arith.addf %2, %4 : vector<16x128xf32>
    %cst_5 = arith.constant 0.000000e+00 : f32
    %6 = vector.broadcast %cst_5 : f32 to vector<16x128xf32>
    %7 = arith.maximumf %5, %6 : vector<16x128xf32>
    %8 = arith.truncf %7 : vector<16x128xf32> to vector<16x128xbf16>
    %c0_6 = arith.constant 0 : index
    %c0_7 = arith.constant 0 : index
    %9 = vector.load %arg3[%c0_6, %c0_7] : memref<128x128xbf16, #tpu.memory_space<vmem>>, vector<128x128xbf16>
    %cst_8 = arith.constant dense<0.000000e+00> : vector<16x128xf32>
    %10 = tpu.matmul %8, %9, %cst_8 {dimension_numbers = #tpu.dot_dimension_numbers<[1], [0], [0], [1], [0, 0, 1, 1], [], []>} : vector<16x128xbf16>, vector<128x128xbf16>, vector<16x128xf32> -> vector<16x128xf32>
    %c0_9 = arith.constant 0 : index
    %c0_10 = arith.constant 0 : index
    %11 = vector.load %arg7[%c0_9, %c0_10] : memref<1x128xf32, #tpu.memory_space<vmem>>, vector<1x128xf32>
    %12 = vector.broadcast %11 : vector<1x128xf32> to vector<16x128xf32>
    %13 = arith.addf %10, %12 : vector<16x128xf32>
    %cst_11 = arith.constant 0.000000e+00 : f32
    %14 = vector.broadcast %cst_11 : f32 to vector<16x128xf32>
    %15 = arith.maximumf %13, %14 : vector<16x128xf32>
    %16 = arith.truncf %15 : vector<16x128xf32> to vector<16x128xbf16>
    %c0_12 = arith.constant 0 : index
    %c0_13 = arith.constant 0 : index
    %17 = vector.load %arg4[%c0_12, %c0_13] : memref<128x128xbf16, #tpu.memory_space<vmem>>, vector<128x128xbf16>
    %cst_14 = arith.constant dense<0.000000e+00> : vector<16x128xf32>
    %18 = tpu.matmul %16, %17, %cst_14 {dimension_numbers = #tpu.dot_dimension_numbers<[1], [0], [0], [1], [0, 0, 1, 1], [], []>} : vector<16x128xbf16>, vector<128x128xbf16>, vector<16x128xf32> -> vector<16x128xf32>
    %c0_15 = arith.constant 0 : index
    %c0_16 = arith.constant 0 : index
    %19 = vector.load %arg8[%c0_15, %c0_16] : memref<1x128xf32, #tpu.memory_space<vmem>>, vector<1x128xf32>
    %20 = vector.broadcast %19 : vector<1x128xf32> to vector<16x128xf32>
    %21 = arith.addf %18, %20 : vector<16x128xf32>
    %cst_17 = arith.constant 0.000000e+00 : f32
    %22 = vector.broadcast %cst_17 : f32 to vector<16x128xf32>
    %23 = arith.maximumf %21, %22 : vector<16x128xf32>
    %24 = arith.truncf %23 : vector<16x128xf32> to vector<16x128xbf16>
    %c0_18 = arith.constant 0 : index
    %c0_19 = arith.constant 0 : index
    %25 = vector.load %arg5[%c0_18, %c0_19] : memref<128x128xbf16, #tpu.memory_space<vmem>>, vector<128x128xbf16>
    %cst_20 = arith.constant dense<0.000000e+00> : vector<16x128xf32>
    %26 = tpu.matmul %24, %25, %cst_20 {dimension_numbers = #tpu.dot_dimension_numbers<[1], [0], [0], [1], [0, 0, 1, 1], [], []>} : vector<16x128xbf16>, vector<128x128xbf16>, vector<16x128xf32> -> vector<16x128xf32>
    %c0_21 = arith.constant 0 : index
    %c0_22 = arith.constant 0 : index
    %27 = vector.load %arg9[%c0_21, %c0_22] : memref<1x128xf32, #tpu.memory_space<vmem>>, vector<1x128xf32>
    %28 = vector.broadcast %27 : vector<1x128xf32> to vector<16x128xf32>
    %29 = arith.addf %26, %28 : vector<16x128xf32>
    %c0_23 = arith.constant 0 : index
    %c0_24 = arith.constant 0 : index
    %30 = vector.load %arg10[%c0_23, %c0_24] : memref<16x128xf32, #tpu.memory_space<vmem>>, vector<16x128xf32>
    tpu.vector_store %arg10[%c0_23, %c0_24], %29 {strides = array<i32>} : memref<16x128xf32, #tpu.memory_space<vmem>>, vector<16x128xf32>,
    return
  }
  func.func @transform_0(%arg0: i32) -> (i32, i32) {
    %c0_i32 = arith.constant 0 : i32
    %c0_i32_0 = arith.constant 0 : i32
    return %arg0, %c0_i32 : i32, i32
  }
  func.func @transform_1(%arg0: i32) -> (i32, i32) {
    %c0_i32 = arith.constant 0 : i32
    %c0_i32_0 = arith.constant 0 : i32
    %c0_i32_1 = arith.constant 0 : i32
    return %c0_i32, %c0_i32_0 : i32, i32
  }
  func.func @transform_2(%arg0: i32) -> (i32, i32) {
    %c0_i32 = arith.constant 0 : i32
    %c0_i32_0 = arith.constant 0 : i32
    %c0_i32_1 = arith.constant 0 : i32
    return %c0_i32, %c0_i32_0 : i32, i32
  }
  func.func @transform_3(%arg0: i32) -> (i32, i32) {
    %c0_i32 = arith.constant 0 : i32
    %c0_i32_0 = arith.constant 0 : i32
    %c0_i32_1 = arith.constant 0 : i32
    return %c0_i32, %c0_i32_0 : i32, i32
  }
  func.func @transform_4(%arg0: i32) -> (i32, i32) {
    %c0_i32 = arith.constant 0 : i32
    %c0_i32_0 = arith.constant 0 : i32
    %c0_i32_1 = arith.constant 0 : i32
    return %c0_i32, %c0_i32_0 : i32, i32
  }
  func.func @transform_5(%arg0: i32) -> (i32, i32) {
    %c0_i32 = arith.constant 0 : i32
    %c0_i32_0 = arith.constant 0 : i32
    %c0_i32_1 = arith.constant 0 : i32
    return %c0_i32, %c0_i32_0 : i32, i32
  }
  func.func @transform_6(%arg0: i32) -> (i32, i32) {
    %c0_i32 = arith.constant 0 : i32
    %c0_i32_0 = arith.constant 0 : i32
    %c0_i32_1 = arith.constant 0 : i32
    return %c0_i32, %c0_i32_0 : i32, i32
  }
  func.func @transform_7(%arg0: i32) -> (i32, i32) {
    %c0_i32 = arith.constant 0 : i32
    %c0_i32_0 = arith.constant 0 : i32
    %c0_i32_1 = arith.constant 0 : i32
    return %c0_i32, %c0_i32_0 : i32, i32
  }
  func.func @transform_8(%arg0: i32) -> (i32, i32) {
    %c0_i32 = arith.constant 0 : i32
    %c0_i32_0 = arith.constant 0 : i32
    %c0_i32_1 = arith.constant 0 : i32
    return %c0_i32, %c0_i32_0 : i32, i32
  }
  func.func @transform_9(%arg0: i32) -> (i32, i32) {
    %c0_i32 = arith.constant 0 : i32
    %c0_i32_0 = arith.constant 0 : i32
    return %arg0, %c0_i32 : i32, i32
  }
}

</mosaic_0001>

<bundles_post_ra>
// kernel: scalar_reward_estimator.1
= control target key start
LH: loop header
LB: loop body
LE: loop exit
PB: predicated region body
PF: predicated region fallthrough
CT: control target
= control target key end

     0   :  { %14 = vsyncpa [#allocation3], 0  ;;  %s815_s0 = inlined_call_operand.vmem [shape: bf16[16,128], index: 0, kind: input, shape index: {}]   ;;  %s816_s1 = inlined_call_operand.hbm [shape: bf16[128,128], index: 1, kind: input, shape index: {}]   ;;  %s817_s2 = inlined_call_operand.hbm [shape: bf16[128,128], index: 2, kind: input, shape index: {}]   ;;  %s818_s3 = inlined_call_operand.hbm [shape: bf16[128,128], index: 3, kind: input, shape index: {}]   ;;  %s819_s4 = inlined_call_operand.hbm [shape: bf16[128,128], index: 4, kind: input, shape index: {}]   ;;  %s820_s5 = inlined_call_operand.vmem [shape: f32[1,128], index: 5, kind: input, shape index: {}]   ;;  %s821_s6 = inlined_call_operand.vmem [shape: f32[1,128], index: 6, kind: input, shape index: {}]   ;;  %s822_s7 = inlined_call_operand.vmem [shape: f32[1,128], index: 7, kind: input, shape index: {}]   ;;  %s823_s8 = inlined_call_operand.vmem [shape: f32[1,128], index: 8, kind: input, shape index: {}]   ;;  %s824_s9 = inlined_call_operand.vmem [shape: f32[16,128], index: 9, kind: output, shape index: {}]  }
   0x1   :  { %15 = vsyncpa [#allocation5], 0 }
   0x2   :  { %16 = vsyncpa [#allocation8], 0  ;;  %s36_s11 = sshll.u32 %s817_s2, 4  ;;  %s726_s12 = smov [#allocation4]   ;;  %s37_s11 = int_to_ptr.hbm [resolvable:$true] %s36_s11 }
   0x3   :  { %s38_s13 = sshll.u32 %s726_s12, 4  ;;  %s23_s16 = sshll.u32 %s816_s1, 4  ;;  %s39_s13 = int_to_ptr.vmem [resolvable:$true] %s38_s13  ;;  %s24_s16 = int_to_ptr.hbm [resolvable:$true] %s23_s16 }
   0x4   :  { %s727_s17 = smov 64   ;;  %s728_s18 = smov 4  }
   0x5   :  { %44 = dma.hbm_to_vmem [thread:$0]  %s37_s11, 1024, %s39_s13, [#allocation5], %s727_s17, %s727_s17, %s728_s18  }
   0x6   :  { %s729_s19 = smov [#allocation2]   ;;  %s49_s23 = sshll.u32 %s818_s3, 4  ;;  %s50_s23 = int_to_ptr.hbm [resolvable:$true] %s49_s23 }
   0x7   :  { %s25_s20 = sshll.u32 %s729_s19, 4  ;;  %s62_s25 = sshll.u32 %s819_s4, 4  ;;  %s26_s20 = int_to_ptr.vmem [resolvable:$true] %s25_s20  ;;  %s63_s25 = int_to_ptr.hbm [resolvable:$true] %s62_s25 }
   0x8   :  { %31 = dma.hbm_to_vmem [thread:$0]  %s24_s16, 1024, %s26_s20, [#allocation3], %s727_s17, %s727_s17, %s728_s18  }
   0x9   :  { %s730_s26 = smov [#allocation6]   ;;  %s731_s1 = smov [#allocation7]  }
   0xa   :  { %s51_s27 = sshll.u32 %s730_s26, 4  ;;  %s64_s28 = sshll.u32 %s731_s1, 4  ;;  %s52_s27 = int_to_ptr.vmem [resolvable:$true] %s51_s27  ;;  %s65_s28 = int_to_ptr.vmem [resolvable:$true] %s64_s28 }
   0xb   :  { %57 = dma.hbm_to_vmem [thread:$0]  %s50_s23, 1024, %s52_s27, [#allocation5], %s727_s17, %s727_s17, %s728_s18  }
   0xc   :  { %70 = dma.hbm_to_vmem [thread:$0]  %s63_s25, 1024, %s65_s28, [#allocation8], %s727_s17, %s727_s17, %s728_s18  }
   0xd   :  { %720 = dma.done.wait [#allocation3], 1024  }
   0xe   :  { %721 = vsyncadd [#allocation3], 4294966272 }
   0xf   :  { %722 = dma.done.wait [#allocation5], 2048  }
  0x10   :  { %723 = vsyncadd [#allocation5], 4294965248 }
  0x11   :  { %724 = dma.done.wait [#allocation8], 1024  }
  0x12   :  { %725 = vsyncadd [#allocation8], 4294966272  ;;  %v589_v0 = vld [vmem:[#allocation2 + $0x38] sm:$0xff]  ;;  %v588_v1 = vld [vmem:[#allocation2 + $0x30] sm:$0xff] }
  0x13   :  { %171 = vmatpush.bf16.msra.mxu0 %v589_v0  ;;  %v597_v2 = vld [vmem:[#allocation4 + $0x38] sm:$0xff]  ;;  %v596_v3 = vld [vmem:[#allocation4 + $0x30] sm:$0xff]  ;;  %v587_v4 = vld [vmem:[#allocation2 + $0x28] sm:$0xff] }
  0x14   :  { %256 = vmatpush.bf16.msra.mxu1 %v597_v2  ;;  %v595_v5 = vld [vmem:[#allocation4 + $0x28] sm:$0xff]  ;;  %v586_v6 = vld [vmem:[#allocation2 + $0x20] sm:$0xff]  ;;  %v585_v8 = vld [vmem:[#allocation2 + $0x18] sm:$0xff] }
  0x15   :  { %v594_v7 = vld [vmem:[#allocation4 + $0x20] sm:$0xff]  ;;  %v584_v9 = vld [vmem:[#allocation2 + $0x10] sm:$0xff]  ;;  %v583_v10 = vld [vmem:[#allocation2 + $0x8] sm:$0xff] }
  0x16   :  { %v582_v11 = vld [vmem:[#allocation2] sm:$0xff]  ;;  %v593_v13 = vld [vmem:[#allocation4 + $0x18] sm:$0xff]  ;;  %v592_v14 = vld [vmem:[#allocation4 + $0x10] sm:$0xff] }
  0x17   :  { %172 = vmatpush.bf16.msra.mxu0 %v588_v1  ;;  %v581_v12 = vld [vmem:[%s815_s0] sm:$0xff]  ;;  %v591_v15 = vld [vmem:[#allocation4 + $0x8] sm:$0xff]  ;;  %v605_v17 = vld [vmem:[#allocation6 + $0x38] sm:$0xff] }
  0x18   :  { %257 = vmatpush.bf16.msra.mxu1 %v596_v3  ;;  %v590_v16 = vld [vmem:[#allocation4] sm:$0xff]  ;;  %341 = vmatpush.bf16.msra.mxu2 %v605_v17  ;;  %v604_v18 = vld [vmem:[#allocation6 + $0x30] sm:$0xff]  ;;  %v603_v19 = vld [vmem:[#allocation6 + $0x28] sm:$0xff] }
  0x19   :  { %v602_v20 = vld [vmem:[#allocation6 + $0x20] sm:$0xff]  ;;  %v601_v29 = vld [vmem:[#allocation6 + $0x18] sm:$0xff]  ;;  %v600_v30 = vld [vmem:[#allocation6 + $0x10] sm:$0xff] }
  0x1a   :  { %v620_v22 = vld [vmem:[%s820_s5] ss:$0 sm:$0xff]  ;;  %v599_v31 = vld [vmem:[#allocation6 + $0x8] sm:$0xff]  ;;  %v613_v33 = vld [vmem:[#allocation7 + $0x38] sm:$0xff] }
  0x1b   :  { %173 = vmatpush.bf16.msra.mxu0 %v587_v4  ;;  %v598_v32 = vld [vmem:[#allocation6] sm:$0xff]  ;;  %426 = vmatpush.bf16.msra.mxu3 %v613_v33  ;;  %v612_v34 = vld [vmem:[#allocation7 + $0x30] sm:$0xff]  ;;  %v611_v35 = vld [vmem:[#allocation7 + $0x28] sm:$0xff] }
  0x1c   :  { %258 = vmatpush.bf16.msra.mxu1 %v595_v5  ;;  %342 = vmatpush.bf16.msra.mxu2 %v604_v18  ;;  %v610_v36 = vld [vmem:[#allocation7 + $0x20] sm:$0xff]  ;;  %v609_v45 = vld [vmem:[#allocation7 + $0x18] sm:$0xff]  ;;  %v608_v46 = vld [vmem:[#allocation7 + $0x10] sm:$0xff] }
  0x1d   :  { %v621_v38 = vld [vmem:[%s821_s6] ss:$0 sm:$0xff]  ;;  %v607_v47 = vld [vmem:[#allocation7 + $0x8] sm:$0xff] }
  0x1e   :  { %v606_v48 = vld [vmem:[#allocation7] sm:$0xff] }
  0x1f   :  { %174 = vmatpush.bf16.msra.mxu0 %v586_v6  ;;  %427 = vmatpush.bf16.msra.mxu3 %v612_v34  ;;  %v622_v50 = vld [vmem:[%s822_s7] ss:$0 sm:$0xff] }
  0x20   :  { %259 = vmatpush.bf16.msra.mxu1 %v594_v7  ;;  %343 = vmatpush.bf16.msra.mxu2 %v603_v19  ;;  %v623_v57 = vld [vmem:[%s823_s8] ss:$0 sm:$0xff] }
  0x23   :  { %175 = vmatpush.bf16.msra.mxu0 %v585_v8  ;;  %428 = vmatpush.bf16.msra.mxu3 %v611_v35 }
  0x24   :  { %260 = vmatpush.bf16.msra.mxu1 %v593_v13  ;;  %344 = vmatpush.bf16.msra.mxu2 %v602_v20 }
  0x27   :  { %176 = vmatpush.bf16.msra.mxu0 %v584_v9  ;;  %429 = vmatpush.bf16.msra.mxu3 %v610_v36 }
  0x28   :  { %261 = vmatpush.bf16.msra.mxu1 %v592_v14  ;;  %345 = vmatpush.bf16.msra.mxu2 %v601_v29 }
  0x2b   :  { %177 = vmatpush.bf16.msra.mxu0 %v583_v10  ;;  %430 = vmatpush.bf16.msra.mxu3 %v609_v45 }
  0x2c   :  { %262 = vmatpush.bf16.msra.mxu1 %v591_v15  ;;  %346 = vmatpush.bf16.msra.mxu2 %v600_v30 }
  0x2f   :  { %178 = vmatpush.bf16.msra.mxu0 %v582_v11  ;;  %431 = vmatpush.bf16.msra.mxu3 %v608_v46 }
  0x30   :  { %263 = vmatpush.bf16.msra.mxu1 %v590_v16  ;;  %347 = vmatpush.bf16.msra.mxu2 %v599_v31 }
  0x32   :  { %179 = vmatmul.bf16.vlgmr.msra.gmra.mxu0 %v581_v12 }
  0x33   :  { %432 = vmatpush.bf16.msra.mxu3 %v607_v47 }
  0x34   :  { %348 = vmatpush.bf16.msra.mxu2 %v598_v32 }
  0x37   :  { %433 = vmatpush.bf16.msra.mxu3 %v606_v48 }
  0xaf   :  { %v180_v21 = vpop.f32.mrf.mxu0 }
  0xb0   :  { %v181_v23 = vadd.f32 %v620_v22, %v180_v21 }
  0xb2   :  { %v185_v26 = vmax.f32 %v181_v23, 0.0 }
  0xb7   :  { %v182_v24 = vpop.f32.mrf.mxu0 }
  0xb8   :  { %v183_v25 = vadd.f32 %v620_v22, %v182_v24 }
  0xba   :  { %v186_v27 = vmax.f32 %v183_v25, 0.0 }
  0xbc   :  { %v187_v28 = vpack.c.bf16 %v186_v27, %v185_v26 }
  0xbe   :  { %264 = vmatmul.bf16.vlgmr.msra.gmra.mxu1 %v187_v28 }
 0x13b   :  { %v265_v37 = vpop.f32.mrf.mxu1 }
 0x13c   :  { %v266_v39 = vadd.f32 %v621_v38, %v265_v37 }
 0x13e   :  { %v270_v42 = vmax.f32 %v266_v39, 0.0 }
 0x143   :  { %v267_v40 = vpop.f32.mrf.mxu1 }
 0x144   :  { %v268_v41 = vadd.f32 %v621_v38, %v267_v40 }
 0x146   :  { %v271_v43 = vmax.f32 %v268_v41, 0.0 }
 0x148   :  { %v272_v44 = vpack.c.bf16 %v271_v43, %v270_v42 }
 0x14a   :  { %349 = vmatmul.bf16.vlgmr.msra.gmra.mxu2 %v272_v44 }
 0x1cd   :  { %v350_v49 = vpop.f32.mrf.mxu2 }
 0x1ce   :  { %v351_v51 = vadd.f32 %v622_v50, %v350_v49 }
 0x1d0   :  { %v355_v54 = vmax.f32 %v351_v51, 0.0 }
 0x1d5   :  { %v352_v52 = vpop.f32.mrf.mxu2 }
 0x1d6   :  { %v353_v53 = vadd.f32 %v622_v50, %v352_v52 }
 0x1d8   :  { %v356_v55 = vmax.f32 %v353_v53, 0.0 }
 0x1da   :  { %v357_v56 = vpack.c.bf16 %v356_v55, %v355_v54 }
 0x1dc   :  { %434 = vmatmul.bf16.vlgmr.msra.gmra.mxu3 %v357_v56 }
 0x25f   :  { %v435_v58 = vpop.f32.mrf.mxu3 }
 0x260   :  { %v436_v59 = vadd.f32 %v623_v57, %v435_v58 }
 0x262   :  { %440 = vst [vmem:[%s824_s9] sm:$0xff] %v436_v59 }
 0x267   :  { %v437_v60 = vpop.f32.mrf.mxu3 }
 0x268   :  { %v438_v61 = vadd.f32 %v623_v57, %v437_v60 }
 0x26a   :  { %441 = vst [vmem:[%s824_s9 + $0x8] sm:$0xff] %v438_v61 }
 0x26b   :  { %446 = vsyncpa [#allocation3], 1 }
 0x26c   :  { %447 = vsyncpa [#allocation5], 1 }
 0x26d   :  { %448 = vsyncpa [#allocation8], 1 }

</bundles_post_ra>
